<compile_context>
chip_gen: v7x
topology: tpu7x:2x2x1
jax: 0.10.0
libtpu: 0.0.40
codegen_flags: <defaults>
</compile_context>

<pallas_src>
import functools

import jax
import jax.numpy as jnp
from jax.experimental import pallas as pl
from jax.experimental.pallas import tpu as pltpu


# ----------------------------- Pallas kernels ------------------------------ #

def _conv_stats_kernel(x_ref, w_ref, y_ref, st_ref, xcol_ref, *, k, t, t_out):
    """Stage A: im2col conv (AvgPool folded into the weights) + per-batch BN partial stats.

    x_ref   : (1, Cin*F, T)      bf16, one batch element, unpadded time
    w_ref   : (Cout, K*Cin*F)    bf16, tap-major, 1/F AvgPool scale folded in
    y_ref   : (1, Cout, T_pad)   f32 conv output (lane-dense; cols >= T_out are zero)
    st_ref  : (1, Cout, 2)       f32 [sum, sum-of-squares] over the valid time columns
    xcol_ref: (K*Cin*F, T_pad)   bf16 VMEM scratch (im2col, zero borders = conv padding)
    """
    pad = k // 2
    cf = x_ref.shape[1]

    # Zero scratch: realizes both the conv "same" padding and the lane padding to T_pad.
    xcol_ref[...] = jnp.zeros_like(xcol_ref)
    xb = x_ref[0]                                        # (Cin*F, T)
    for j in range(k):                                   # static unroll, K is small
        dst_lo = max(0, pad - j)
        dst_hi = min(t_out, pad - j + t)
        ln = dst_hi - dst_lo
        src_lo = dst_lo + j - pad
        xcol_ref[j * cf:(j + 1) * cf, dst_lo:dst_lo + ln] = xb[:, src_lo:src_lo + ln]

    # One bf16 MXU matmul for the whole (pool + conv), f32 accumulation.
    y = jnp.dot(w_ref[...], xcol_ref[...], preferred_element_type=jnp.float32)
    y_ref[0] = y

    # Padded columns of xcol are zero => padded columns of y are zero => full-lane reductions
    # equal the sums over the valid columns (wrapper divides by N*T_out).
    st_ref[0, :, 0:1] = jnp.sum(y, axis=1, keepdims=True)
    st_ref[0, :, 1:2] = jnp.sum(y * y, axis=1, keepdims=True)


def _bn_relu_kernel(y_ref, sc_ref, sh_ref, o_ref):
    """Stage B: y * (gamma*rsqrt(var+eps)) + (beta - mean*scale), then ReLU."""
    o_ref[0] = jnp.maximum(y_ref[0] * sc_ref[...] + sh_ref[...], 0.0)


# ------------------------------- wrapper ----------------------------------- #

def conv_h_forward(x, w, bias, gamma, beta, *, eps=1e-5):
    n, cin, freq, t = x.shape
    cout, _, k = w.shape
    pad = k // 2
    t_out = t + 2 * pad - k + 1                       # PyTorch Conv1d output length
    t_pad = ((max(t_out, 1) + 127) // 128) * 128      # lane-dense width (multiple of 128)
    cf = cin * freq
    kcf = k * cf

    # The conv bias cancels exactly under training-mode BatchNorm (y - mean(y)); drop it.
    del bias

    # Wrapper-side layout plumbing (single fused cast/reshape pass; no padding of x):
    x_r = x.reshape(n, cf, t).astype(jnp.bfloat16)
    # w_fused[co, (j, ci, f)] = w[co, ci, j] / F : AvgPool folded into the MXU contraction.
    w_fused = (jnp.broadcast_to(jnp.transpose(w, (0, 2, 1))[:, :, :, None],
                                (cout, k, cin, freq)) * (1.0 / freq)
               ).reshape(cout, kcf).astype(jnp.bfloat16)

    y, stats = pl.pallas_call(
        functools.partial(_conv_stats_kernel, k=k, t=t, t_out=t_out),
        out_shape=(jax.ShapeDtypeStruct((n, cout, t_pad), jnp.float32),
                   jax.ShapeDtypeStruct((n, cout, 2), jnp.float32)),
        grid=(n,),
        in_specs=[
            pl.BlockSpec((1, cf, t), lambda b: (b, 0, 0)),
            pl.BlockSpec((cout, kcf), lambda b: (0, 0)),
        ],
        out_specs=(
            pl.BlockSpec((1, cout, t_pad), lambda b: (b, 0, 0)),
            pl.BlockSpec((1, cout, 2), lambda b: (b, 0, 0)),
        ),
        scratch_shapes=[pltpu.VMEM((kcf, t_pad), jnp.bfloat16)],
        compiler_params=pltpu.CompilerParams(dimension_semantics=("parallel",)),
    )(x_r, w_fused)

    # Tiny per-channel reductions + affine fold (O(Cout) work, plain JAX).
    cnt = float(n * t_out)
    mean = jnp.sum(stats[:, :, 0], axis=0) / cnt
    var = jnp.sum(stats[:, :, 1], axis=0) / cnt - mean * mean   # biased variance, f32
    scale = gamma * jax.lax.rsqrt(var + eps)                    # gamma fused into rsqrt
    shift = beta - mean * scale

    out = pl.pallas_call(
        _bn_relu_kernel,
        out_shape=jax.ShapeDtypeStruct((n, cout, t_pad), jnp.float32),
        grid=(n,),
        in_specs=[
            pl.BlockSpec((1, cout, t_pad), lambda b: (b, 0, 0)),
            pl.BlockSpec((cout, 1), lambda b: (0, 0)),
            pl.BlockSpec((cout, 1), lambda b: (0, 0)),
        ],
        out_specs=pl.BlockSpec((1, cout, t_pad), lambda b: (b, 0, 0)),
        compiler_params=pltpu.CompilerParams(dimension_semantics=("parallel",)),
    )(y, scale.reshape(cout, 1).astype(jnp.float32),
      shift.reshape(cout, 1).astype(jnp.float32))

    # Lane-dense slab -> valid T_out columns: pure layout plumbing.
    return out[:, :, :t_out]


# --------------------------- plain-JAX reference ---------------------------- #

def conv_h_reference(x, w, bias, gamma, beta, *, eps=1e-5):
    pooled = jnp.mean(x, axis=2)               # AvgPool2d((freq,1)) + squeeze(2)
    k = w.shape[-1]
    pad = k // 2
    y = jax.lax.conv_general_dilated(
        pooled, w, window_strides=(1,), padding=[(pad, pad)],
        dimension_numbers=("NCH", "OIH", "NCH"))
    y = y + bias[None, :, None]
    m = jnp.mean(y, axis=(0, 2), keepdims=True)
    v = jnp.mean((y - m) ** 2, axis=(0, 2), keepdims=True)
    yhat = (y - m) / jnp.sqrt(v + eps)
    return jnp.maximum(yhat * gamma[None, :, None] + beta[None, :, None], 0.0)


# ---------------------------------- main ------------------------------------ #

if __name__ == "__main__":
    # Small shapes consistent with Conv_H's forward: x is (batch, ch, freq, time).
    N, C_IN, FREQ, TIME = 2, 4, 16, 16
    C_OUT, FILTER_LEN = 8, 3

    key = jax.random.PRNGKey(0)
    kx, kw, kb, kg, kbt = jax.random.split(key, 5)

    x = jax.random.normal(kx, (N, C_IN, FREQ, TIME), dtype=jnp.float32)
    # Deterministic synthetic parameters (shapes match nn.Conv1d / nn.BatchNorm1d).
    w = 0.2 * jax.random.normal(kw, (C_OUT, C_IN, FILTER_LEN), dtype=jnp.float32)
    bias = 0.1 * jax.random.normal(kb, (C_OUT,), dtype=jnp.float32)
    gamma = 1.0 + 0.1 * jax.random.normal(kg, (C_OUT,), dtype=jnp.float32)
    beta = 0.1 * jax.random.normal(kbt, (C_OUT,), dtype=jnp.float32)

    out = jax.block_until_ready(conv_h_forward(x, w, bias, gamma, beta))
    ref = conv_h_reference(x, w, bias, gamma, beta)

    assert out.shape == (N, C_OUT, TIME), out.shape
    # bf16 MXU inputs (f32 accumulation): tolerance reflects bf16 rounding of x / weights only;
    # a real bug would produce O(1) errors.
    assert jnp.allclose(out, ref, rtol=3e-2, atol=3e-2), float(jnp.max(jnp.abs(out - ref)))

    print("KERNEL_OK")
</pallas_src>

<mosaic_0001>
module attributes {stable_mosaic.version = 11 : i64} {
  func.func @_conv_stats_kernel(%arg0: i32, %arg1: memref<1x64x16xbf16, #tpu.memory_space<vmem>>, %arg2: memref<8x192xbf16, #tpu.memory_space<vmem>>, %arg3: memref<1x8x128xf32, #tpu.memory_space<vmem>>, %arg4: memref<1x8x2xf32, #tpu.memory_space<vmem>>, %arg5: memref<192x128xbf16, #tpu.memory_space<vmem>>) attributes {dimension_semantics = [#tpu.dimension_semantics<parallel>], iteration_bounds = array<i64: 2>, scalar_prefetch = 0 : i64, scratch_operands = 1 : i64, tpu.core_type = #tpu.core_type<tc>, window_params = [{transform_indices = @transform_0, window_bounds = array<i64: 1, 64, 16>}, {pipeline_mode = #tpu.pipeline_mode<synchronous>, transform_indices = @transform_1, window_bounds = array<i64: 8, 192>}, {transform_indices = @transform_2, window_bounds = array<i64: 1, 8, 128>}, {transform_indices = @transform_3, window_bounds = array<i64: 1, 8, 2>}]} {
    %cst = arith.constant 0.000000e+00 : bf16
    %0 = vector.broadcast %cst : bf16 to vector<192x128xbf16>
    %c0 = arith.constant 0 : index
    %c0_0 = arith.constant 0 : index
    %1 = vector.load %arg5[%c0, %c0_0] : memref<192x128xbf16, #tpu.memory_space<vmem>>, vector<192x128xbf16>
    tpu.vector_store %arg5[%c0, %c0_0], %0 {strides = array<i32>} : memref<192x128xbf16, #tpu.memory_space<vmem>>, vector<192x128xbf16>,
    %c0_1 = arith.constant 0 : index
    %c0_2 = arith.constant 0 : index
    %c0_3 = arith.constant 0 : index
    %2 = vector.load %arg1[%c0_1, %c0_2, %c0_3] : memref<1x64x16xbf16, #tpu.memory_space<vmem>>, vector<1x64x16xbf16>
    %3 = vector.shape_cast %2 : vector<1x64x16xbf16> to vector<64x16xbf16>
    %4 = vector.extract_strided_slice %3 {offsets = [0, 0], sizes = [64, 15], strides = [1, 1]} : vector<64x16xbf16> to vector<64x15xbf16>
    %c0_4 = arith.constant 0 : index
    %c1 = arith.constant 1 : index
    %5 = vector.load %arg5[%c0_4, %c1] : memref<192x128xbf16, #tpu.memory_space<vmem>>, vector<64x15xbf16>
    tpu.vector_store %arg5[%c0_4, %c1], %4 {strides = array<i32>} : memref<192x128xbf16, #tpu.memory_space<vmem>>, vector<64x15xbf16>,
    %c64 = arith.constant 64 : index
    %c0_5 = arith.constant 0 : index
    %6 = vector.load %arg5[%c64, %c0_5] : memref<192x128xbf16, #tpu.memory_space<vmem>>, vector<64x16xbf16>
    tpu.vector_store %arg5[%c64, %c0_5], %3 {strides = array<i32>} : memref<192x128xbf16, #tpu.memory_space<vmem>>, vector<64x16xbf16>,
    %7 = vector.extract_strided_slice %3 {offsets = [0, 1], sizes = [64, 15], strides = [1, 1]} : vector<64x16xbf16> to vector<64x15xbf16>
    %c128 = arith.constant 128 : index
    %c0_6 = arith.constant 0 : index
    %8 = vector.load %arg5[%c128, %c0_6] : memref<192x128xbf16, #tpu.memory_space<vmem>>, vector<64x15xbf16>
    tpu.vector_store %arg5[%c128, %c0_6], %7 {strides = array<i32>} : memref<192x128xbf16, #tpu.memory_space<vmem>>, vector<64x15xbf16>,
    %c0_7 = arith.constant 0 : index
    %c0_8 = arith.constant 0 : index
    %9 = vector.load %arg2[%c0_7, %c0_8] : memref<8x192xbf16, #tpu.memory_space<vmem>>, vector<8x192xbf16>
    %c0_9 = arith.constant 0 : index
    %c0_10 = arith.constant 0 : index
    %10 = vector.load %arg5[%c0_9, %c0_10] : memref<192x128xbf16, #tpu.memory_space<vmem>>, vector<192x128xbf16>
    %cst_11 = arith.constant dense<0.000000e+00> : vector<8x128xf32>
    %11 = tpu.matmul %9, %10, %cst_11 {dimension_numbers = #tpu.dot_dimension_numbers<[1], [0], [0], [1], [0, 0, 1, 1], [], []>} : vector<8x192xbf16>, vector<192x128xbf16>, vector<8x128xf32> -> vector<8x128xf32>
    %c0_12 = arith.constant 0 : index
    %c0_13 = arith.constant 0 : index
    %c0_14 = arith.constant 0 : index
    %12 = vector.load %arg3[%c0_12, %c0_13, %c0_14] : memref<1x8x128xf32, #tpu.memory_space<vmem>>, vector<1x8x128xf32>
    %13 = vector.shape_cast %12 : vector<1x8x128xf32> to vector<8x128xf32>
    %14 = vector.shape_cast %11 : vector<8x128xf32> to vector<1x8x128xf32>
    tpu.vector_store %arg3[%c0_12, %c0_13, %c0_14], %14 {strides = array<i32>} : memref<1x8x128xf32, #tpu.memory_space<vmem>>, vector<1x8x128xf32>,
    %cst_15 = arith.constant dense<0.000000e+00> : vector<8xf32>
    %15 = vector.multi_reduction <add>, %11, %cst_15 [1] : vector<8x128xf32> to vector<8xf32>
    %16 = vector.shape_cast %15 : vector<8xf32> to vector<8x1xf32>
    %c0_16 = arith.constant 0 : index
    %c0_17 = arith.constant 0 : index
    %c0_18 = arith.constant 0 : index
    %17 = vector.load %arg4[%c0_16, %c0_17, %c0_18] : memref<1x8x2xf32, #tpu.memory_space<vmem>>, vector<1x8x1xf32>
    %18 = vector.shape_cast %17 : vector<1x8x1xf32> to vector<8x1xf32>
    %19 = vector.shape_cast %16 : vector<8x1xf32> to vector<1x8x1xf32>
    tpu.vector_store %arg4[%c0_16, %c0_17, %c0_18], %19 {strides = array<i32>} : memref<1x8x2xf32, #tpu.memory_space<vmem>>, vector<1x8x1xf32>,
    %20 = arith.mulf %11, %11 : vector<8x128xf32>
    %cst_19 = arith.constant dense<0.000000e+00> : vector<8xf32>
    %21 = vector.multi_reduction <add>, %20, %cst_19 [1] : vector<8x128xf32> to vector<8xf32>
    %22 = vector.shape_cast %21 : vector<8xf32> to vector<8x1xf32>
    %c0_20 = arith.constant 0 : index
    %c0_21 = arith.constant 0 : index
    %c1_22 = arith.constant 1 : index
    %23 = vector.load %arg4[%c0_20, %c0_21, %c1_22] : memref<1x8x2xf32, #tpu.memory_space<vmem>>, vector<1x8x1xf32>
    %24 = vector.shape_cast %23 : vector<1x8x1xf32> to vector<8x1xf32>
    %25 = vector.shape_cast %22 : vector<8x1xf32> to vector<1x8x1xf32>
    tpu.vector_store %arg4[%c0_20, %c0_21, %c1_22], %25 {strides = array<i32>} : memref<1x8x2xf32, #tpu.memory_space<vmem>>, vector<1x8x1xf32>,
    return
  }
  func.func @transform_0(%arg0: i32) -> (i32, i32, i32) {
    %c0_i32 = arith.constant 0 : i32
    %c0_i32_0 = arith.constant 0 : i32
    %c0_i32_1 = arith.constant 0 : i32
    return %arg0, %c0_i32, %c0_i32_0 : i32, i32, i32
  }
  func.func @transform_1(%arg0: i32) -> (i32, i32) {
    %c0_i32 = arith.constant 0 : i32
    %c0_i32_0 = arith.constant 0 : i32
    %c0_i32_1 = arith.constant 0 : i32
    return %c0_i32, %c0_i32_0 : i32, i32
  }
  func.func @transform_2(%arg0: i32) -> (i32, i32, i32) {
    %c0_i32 = arith.constant 0 : i32
    %c0_i32_0 = arith.constant 0 : i32
    %c0_i32_1 = arith.constant 0 : i32
    return %arg0, %c0_i32, %c0_i32_0 : i32, i32, i32
  }
  func.func @transform_3(%arg0: i32) -> (i32, i32, i32) {
    %c0_i32 = arith.constant 0 : i32
    %c0_i32_0 = arith.constant 0 : i32
    %c0_i32_1 = arith.constant 0 : i32
    return %arg0, %c0_i32, %c0_i32_0 : i32, i32, i32
  }
}

</mosaic_0001>

<bundles_post_ra>
// kernel: tpu_custom_call.1
= control target key start
LH: loop header
LB: loop body
LE: loop exit
PB: predicated region body
PF: predicated region fallthrough
CT: control target
= control target key end

     0   :  { %9 = vsyncpa [#allocation4], 0  ;;  %s731_s0 = inlined_call_operand.vmem [shape: bf16[2,64,16], index: 0, kind: input, shape index: {}]   ;;  %s732_s1 = inlined_call_operand.vmem [shape: bf16[8,192], index: 1, kind: input, shape index: {}]   ;;  %s733_s2 = inlined_call_operand.hbm [shape: f32[2,8,128], index: 2, kind: output, shape index: {0}]   ;;  %s734_s3 = inlined_call_operand.vmem [shape: f32[2,8,2], index: 3, kind: output, shape index: {1}]  }
   0x1   :  { %11 = vsyncpa [#allocation4 + $0x1], 0  ;;  %s597_s12 = smov 0   ;;  %s599_s13 = smov 0  }
   0x2   :  { %s601_s14 = smov 0   ;;  %s603_s15 = smov 0  }
   0x3 LB: > { %s618_s16 = sadd.s32 4294967295, %s571_s15   ;;  %s441_s17 = sadd.s32 4294967294, %s571_s15   ;;  %s571_s15 = sphi %s603_s15, %s740_s15   ;;  %s567_s14 = sphi %s601_s14, %s739_s14   ;;  %s563_s13 = sphi %s599_s13, %s738_s13   ;;  %s559_s12 = sphi %s597_s12, %s737_s12  }
   0x4   : > { %s622_s18 = sadd.s32 1, %s571_s15   ;;  %s71_s19 = sadd.s32 1, %s567_s14 }
   0x5   : > { %s68_s20 = ssub.s32 %s571_s15, %s622_s18  ;;  %p81_p0 = scmp.ne.s32.totalorder %s567_s14, %s563_s13 }
   0x6   : > { %p69_p1 = scmp.eq.s32.totalorder %s68_s20, 0  ;;  %p82_p2 = scmp.eq.s32.totalorder %s618_s16, 1 }
   0x7   : > { %p87_p3 = scmp.ne.s32.totalorder %s563_s13, %s559_s12  ;;  %p88_p4 = scmp.eq.s32.totalorder %s441_s17, 1 }
   0x8   : > { %s633_s21 = scalar_select %p69_p1, %s567_s14, %s71_s19  }
   0x9   : > { %p635_p5 = por %p82_p2, %p81_p0  ;;  %p639_p6 = por %p88_p4, %p87_p3 }
   0xa   : > { %p444_p7 = scmp.ge.s32.totalorder %s571_s15, 1  ;;  %p143_p8 = scmp.lt.s32.totalorder %s571_s15, 3 }
   0xc   : > { %p144_p9 = pnand %p444_p7, %p143_p8 }
   0xd   : > { %p171_p10 = scmp.lt.s32.totalorder (!%p144_p9), %s618_s16, 1  ;;  %v573_v0 = vmov (!%p144_p9), 0   ;;  %vm242_vm0 = vcmask (!%p144_p9), 130048   ;;  %s574_s29 = smov (!%p144_p9), 1   ;;  %v264_v5 = vld [vmem:[%s732_s1] sm:$0xff] (!%p144_p9)  ;;  %vm283_vm1 = vcmask (!%p144_p9), 523264  }
   0xe   : > { %147 = sbr.rel (%p144_p9) target bundleno = 553 (0x229), region = 28  ;;  %185 = vst [vmem:[#allocation2 + $0x20] sm:$0xff] (!%p144_p9), %v573_v0  ;;  %181 = vst [vmem:[#allocation2] sm:$0xff] (!%p144_p9), %v573_v0  ;;  %287 = vmatprep.subr.bf16.mxu0 (!%p144_p9), %v573_v0  ;;  %s575_s30 = smov (!%p144_p9), 127   ;;  %v454_v6 = vcombine.high (!%p144_p9), %v264_v5, %v264_v5  ;;  %vm233_vm2 = vcmask (!%p144_p9), 130056   ;;  %vm259_vm3 = vcmask (!%p144_p9), 121856   ;;  %v453_v27 = vcombine.low (!%p144_p9), %v264_v5, %v264_v5 }
   0xf   : > { %182 = vst [vmem:[#allocation2 + $0x8] sm:$0xff] (!%p144_p9), %v573_v0  ;;  %183 = vst [vmem:[#allocation2 + $0x10] sm:$0xff] (!%p144_p9), %v573_v0  ;;  %s162_s6 = sand.u32 (!%p144_p9), 1, %s563_s13   ;;  %s457_s9 = sshll.u32 (!%p144_p9), %s618_s16, 7 }
  0x10   : > { %184 = vst [vmem:[#allocation2 + $0x18] sm:$0xff] (!%p144_p9), %v573_v0  ;;  %186 = vst [vmem:[#allocation2 + $0x28] sm:$0xff] (!%p144_p9), %v573_v0  ;;  %455 = vmatprep.mubr.msk.bf16.mxu0 (!%p144_p9), %vm283_vm1, %v454_v6  ;;  %s445_s7 = sshll.u32 (!%p144_p9), %s162_s6, 3  ;;  %s691_s19 = scalar_lea.hbm (!%p144_p9), %s733_s2, %s457_s9 }
  0x11   : > { %187 = vst [vmem:[#allocation2 + $0x30] sm:$0xff] (!%p144_p9), %v573_v0  ;;  %188 = vst [vmem:[#allocation2 + $0x38] sm:$0xff] (!%p144_p9), %v573_v0  ;;  %s164_s8 = scalar_lea.vmem (!%p144_p9), [#allocation3], %s445_s7  ;;  %s338_s20 = scalar_lea.sflag (!%p144_p9), [#allocation4], %s162_s6 }
  0x12   : > { %189 = vst [vmem:[#allocation2 + $0x40] sm:$0xff] (!%p144_p9), %v573_v0  ;;  %190 = vst [vmem:[#allocation2 + $0x48] sm:$0xff] (!%p144_p9), %v573_v0  ;;  %s355_s10 = sshll.u32 (!%p144_p9), %s164_s8, 4  ;;  %s576_s26 = smov (!%p144_p9), [#allocation3]   ;;  %s356_s10 = int_to_ptr.vmem [resolvable:$true] %s355_s10 }
  0x13   : > { %191 = vst [vmem:[#allocation2 + $0x50] sm:$0xff] (!%p144_p9), %v573_v0  ;;  %192 = vst [vmem:[#allocation2 + $0x58] sm:$0xff] (!%p144_p9), %v573_v0  ;;  %s513_s27 = sshll.u32 (!%p144_p9), %s576_s26, 4  ;;  %s514_s27 = int_to_ptr.vmem [resolvable:$false] %s513_s27 }
  0x14   : > { %p516_p0 = scmp.lt.s32.totalorder (!%p144_p9), %s356_s10, %s514_s27 }
  0x15   : > { %s662_s24 = scalar_select %p171_p10, %s618_s16, 1 }
  0x17   : > { %s460_s25 = sshll.u32 %s662_s24, 5 }
  0x18   : > { %s175_s28 = scalar_lea.vmem %s731_s0, %s460_s25  ;;  %s509_s25 = scalar_lea.vmem %s356_s10, 128 }
  0x19   : > { %v503_v1 = vld [vmem:[%s175_s28] sm:$0xff]   ;;  %v504_v2 = vld [vmem:[%s175_s28 + $0x8] sm:$0xff]   ;;  %v505_v3 = vld [vmem:[%s175_s28 + $0x10] sm:$0xff]   ;;  %p510_p11 = scmp.ne.s32.totalorder %s356_s10, %s509_s25 }
  0x1a   : > { %221 = vrot.lane.b32.xlu0 %v503_v1, %s574_s29  ;;  %243 = vst.msk [vmem:[#allocation2 + $0x20] sm:$0xff] %vm242_vm0, %v503_v1  ;;  %244 = vst.msk [vmem:[#allocation2 + $0x28] sm:$0xff] %vm242_vm0, %v504_v2  ;;  %v506_v4 = vld [vmem:[%s175_s28 + $0x18] sm:$0xff]   ;;  %225 = vrot.lane.b32.xlu1 %v505_v3, %s574_s29  ;;  %s515_s28 = scalar_lea.vmem %s514_s27, 256 }
  0x1b   : > { %245 = vst.msk [vmem:[#allocation2 + $0x30] sm:$0xff] %vm242_vm0, %v505_v3  ;;  %246 = vst.msk [vmem:[#allocation2 + $0x38] sm:$0xff] %vm242_vm0, %v506_v4  ;;  %p511_p12 = pnand %p510_p11, %p635_p5  ;;  %p517_p1 = scmp.lt.s32.totalorder %s515_s28, %s509_s25 }
  0x1d   : > { %p512_p13 = pneg %p511_p12  ;;  %p518_p2 = por %p517_p1, %p516_p0 }
  0x1e   : > { %223 = vrot.lane.b32.xlu0 %v504_v2, %s574_s29  ;;  %227 = vrot.lane.b32.xlu1 %v506_v4, %s574_s29 }
  0x1f   : > { %p519_p3 = pnand %p518_p2, %p512_p13 }
  0x21   : > { %v269_v19 = vld [vmem:[#allocation2 + $0x20] sm:$0xff]  ;;  %v270_v20 = vld [vmem:[#allocation2 + $0x28] sm:$0xff] }
  0x22   : > { %247 = vrot.lane.b32.xlu0 %v503_v1, %s575_s30  ;;  %249 = vrot.lane.b32.xlu1 %v504_v2, %s575_s30  ;;  %v271_v21 = vld [vmem:[#allocation2 + $0x30] sm:$0xff]  ;;  %v272_v22 = vld [vmem:[#allocation2 + $0x38] sm:$0xff] }
  0x26   : > { %251 = vrot.lane.b32.xlu0 %v505_v3, %s575_s30  ;;  %253 = vrot.lane.b32.xlu1 %v506_v4, %s575_s30 }
  0x8c   : > { %v222_v7 = vpop.permute.xlu0 %221  ;;  %v226_v8 = vpop.permute.xlu1 %225 }
  0x8d   : > { %234 = vst.msk [vmem:[#allocation2] sm:$0xff] %vm233_vm2, %v222_v7  ;;  %236 = vst.msk [vmem:[#allocation2 + $0x10] sm:$0xff] %vm233_vm2, %v226_v8 }
  0x90   : > { %v224_v9 = vpop.permute.xlu0 %223  ;;  %v228_v10 = vpop.permute.xlu1 %227 }
  0x91   : > { %235 = vst.msk [vmem:[#allocation2 + $0x8] sm:$0xff] %vm233_vm2, %v224_v9  ;;  %237 = vst.msk [vmem:[#allocation2 + $0x18] sm:$0xff] %vm233_vm2, %v228_v10 }
  0x94   : > { %v265_v11 = vld [vmem:[#allocation2] sm:$0xff]  ;;  %v248_v12 = vpop.permute.xlu0 %247  ;;  %v250_v13 = vpop.permute.xlu1 %249  ;;  %v267_v16 = vld [vmem:[#allocation2 + $0x10] sm:$0xff] }
  0x95   : > { %288 = vmatpush1.bf16.msra.mxu0 %v265_v11  ;;  %260 = vst.msk [vmem:[#allocation2 + $0x40] sm:$0xff] %vm259_vm3, %v248_v12  ;;  %261 = vst.msk [vmem:[#allocation2 + $0x48] sm:$0xff] %vm259_vm3, %v250_v13 }
  0x96   : > { %289 = vmatprep.subr.bf16.mxu0 %v573_v0 }
  0x98   : > { %v266_v14 = vld [vmem:[#allocation2 + $0x8] sm:$0xff]  ;;  %v252_v15 = vpop.permute.xlu0 %251  ;;  %v254_v17 = vpop.permute.xlu1 %253  ;;  %v268_v18 = vld [vmem:[#allocation2 + $0x18] sm:$0xff] }
  0x99   : > { %290 = vmatpush1.bf16.msra.mxu0 %v266_v14  ;;  %262 = vst.msk [vmem:[#allocation2 + $0x50] sm:$0xff] %vm259_vm3, %v252_v15  ;;  %263 = vst.msk [vmem:[#allocation2 + $0x58] sm:$0xff] %vm259_vm3, %v254_v17 }
  0x9a   : > { %291 = vmatprep.subr.bf16.mxu0 %v573_v0 }
  0x9c   : > { %v273_v23 = vld [vmem:[#allocation2 + $0x40] sm:$0xff]  ;;  %v274_v24 = vld [vmem:[#allocation2 + $0x48] sm:$0xff] }
  0x9d   : > { %292 = vmatpush1.bf16.msra.mxu0 %v267_v16 }
  0x9e   : > { %293 = vmatprep.subr.bf16.mxu0 %v573_v0 }
  0xa0   : > { %v275_v25 = vld [vmem:[#allocation2 + $0x50] sm:$0xff]  ;;  %v276_v26 = vld [vmem:[#allocation2 + $0x58] sm:$0xff] }
  0xa1   : > { %294 = vmatpush1.bf16.msra.mxu0 %v268_v18 }
  0xa2   : > { %295 = vmatprep.subr.bf16.mxu0 %v573_v0 }
  0xa5   : > { %296 = vmatpush1.bf16.msra.mxu0 %v269_v19 }
  0xa6   : > { %297 = vmatprep.subr.bf16.mxu0 %v573_v0 }
  0xa9   : > { %298 = vmatpush1.bf16.msra.mxu0 %v270_v20 }
  0xaa   : > { %299 = vmatprep.subr.bf16.mxu0 %v573_v0 }
  0xad   : > { %300 = vmatpush1.bf16.msra.mxu0 %v271_v21 }
  0xae   : > { %301 = vmatprep.subr.bf16.mxu0 %v573_v0 }
  0xb1   : > { %302 = vmatpush1.bf16.msra.mxu0 %v272_v22 }
  0xb2   : > { %303 = vmatprep.subr.bf16.mxu0 %v573_v0 }
  0xb5   : > { %304 = vmatpush1.bf16.msra.mxu0 %v273_v23 }
  0xb6   : > { %305 = vmatprep.subr.bf16.mxu0 %v573_v0 }
  0xb9   : > { %306 = vmatpush1.bf16.msra.mxu0 %v274_v24 }
  0xba   : > { %307 = vmatprep.subr.bf16.mxu0 %v573_v0 }
  0xbd   : > { %308 = vmatpush1.bf16.msra.mxu0 %v275_v25 }
  0xbe   : > { %309 = vmatprep.subr.bf16.mxu0 %v573_v0 }
  0xc1   : > { %310 = vmatpush1.bf16.msra.mxu0 %v276_v26 }
  0xc4   : > { %320 = vmatmul.mubr.bf16.vlgmr.msra.gmra.mrb[0].mxu0 %v453_v27 }
 0x197   : > { %v321_v28 = vpop.f32.mrb[0].mxu0 }
 0x198   : > { %328 = vadd.xlane.f32.xlu0 %v321_v28  ;;  %v323_v29 = vpop.f32.mrb[1].mxu0  ;;  %v332_v30 = vmul.f32 %v321_v28, %v321_v28  ;;  %327 = vst [vmem:[%s164_s8] sm:$0xff] %v321_v28 }
 0x199   : > { %v324_v31 = vpop.f32.mrb[2].mxu0 }
 0x19a   : > { %333 = vadd.xlane.f32.xlu1 %v332_v30  ;;  %v325_v32 = vpop.f32.mrb[3].mxu0 }
 0x19b   : > { %522 = shalt.err (!%p519_p3)
}
 0x19c   : > { %s523_s16 = scalar_lea.hbm %s691_s19, 128  ;;  %s527_s4 = scalar_lea.hbm %s733_s2, 256 }
 0x19d   : > { %p524_p4 = scmp.ne.s32.totalorder %s691_s19, %s523_s16  ;;  %p528_p9 = scmp.lt.u32.totalorder %s691_s19, %s733_s2 }
 0x19e   : > { %p529_p10 = scmp.lt.u32.totalorder %s527_s4, %s523_s16  ;;  %p531_p12 = scmp.lt.u32.totalorder %s523_s16, %s691_s19 }
 0x19f   : > { %p525_p7 = pnand %p524_p4, %p635_p5 }
 0x1a0   : > { %p530_p11 = por %p529_p10, %p528_p9 }
 0x1a1   : > { %p526_p8 = pneg %p525_p7 }
 0x1a2   : > { %p532_p13 = por %p531_p12, %p530_p11 }
 0x1a4   : > { %p533_p0 = pnand %p532_p13, %p526_p8 }
 0x1a6   : > { %536 = shalt.err (!%p533_p0)
}
 0x1a7   : > { %461 = dma.vmem_to_hbm [thread:$0]  (%p635_p5), %s356_s10, 128, %s691_s19, %s338_s20   ;;  %vm330_vm4 = vcmask 7168   ;;  %vm335_vm5 = vcmask 15368  }
 0x1a8   : > { %s448_s7 = sshll.u32 %s662_s24, 3 }
 0x1a9   : > { %s179_s11 = scalar_lea.vmem %s734_s3, %s448_s7 }
 0x225   : > { %v329_v33 = vpop.xlane.xlu0 %328 }
 0x226   : > { %331 = vst.msk [vmem:[%s179_s11] sm:$0xff] %vm330_vm4, %v329_v33 }
 0x227   : > { %v334_v34 = vpop.xlane.xlu1 %333 }
 0x228   : > { %336 = vst.msk [vmem:[%s179_s11] sm:$0xff] %vm335_vm5, %v334_v34 }
 0x229 PF: > { %p467_p1 = scmp.ge.s32.totalorder %s571_s15, 2  ;;  %s370_s22 = sand.u32 1, %s559_s12  }
 0x22a   : > { %s371_s10 = scalar_lea.sflag [#allocation4], %s370_s22 }
 0x22b   : > { %p464_p2 = pnand %p467_p1, %p639_p6 }
 0x22d   : > { %554 = dma.done.wait (!%p464_p2), %s371_s10, 128  }
 0x22e   : > { %556 = vsyncadd (!%p464_p2), %s371_s10, 4294967168  ;;  %p14_p5 = scmp.ge.s32.totalorder %s622_s18, 4   ;;  %s737_s12 = smov %s563_s13 }
 0x22f   : > { %s738_s13 = smov %s567_s14  ;;  %s739_s14 = smov %s633_s21 }
 0x230   : > { %s740_s15 = smov %s622_s18  ;;  %16 = sbr.rel (!%p14_p5) target bundleno = 3 (0x3), region = 75 }
 0x237   :  { %383 = vsyncpa [#allocation4], 1 }
 0x238   :  { %385 = vsyncpa [#allocation4 + $0x1], 1 }

</bundles_post_ra>
